<compile_context>
chip_gen: v7x
topology: tpu7x:2x2x1
jax: 0.10.0
libtpu: 0.0.40
codegen_flags: <defaults>
</compile_context>

<pallas_src>
import math
import jax
import jax.numpy as jnp
from jax.experimental import pallas as pl
from jax.experimental.pallas import tpu as pltpu

# ----------------------------- hyperparameters ------------------------------
VOCAB = 256          # vocab_size
EMB = 128            # embedding_size
ENC_DIM = 128        # enc_dim (also enc_size of the latent distribution)
N_ENC_LAYERS = 2     # n_encoding_layers
N_LATENT = 32        # latent_distribution.n_latent
ALPHA = 1.0
MU_BN_EPS = 1e-4     # BatchNorm1d(eps=0.0001) for mu
LV_BN_EPS = 1e-3     # BatchNorm1d(eps=0.001) for logvar
BATCH = 16           # whole batch handled in one grid step
OUT_LANES = 128      # lane-dense output width

PRIOR_VAR = 1.0 / ALPHA - 2.0 / N_LATENT + 1.0 / (N_LATENT * N_LATENT)
PRIOR_LOGVAR = math.log(PRIOR_VAR)


def _softplus(x):
    # numerically stable softplus = logaddexp(x, 0), written with basic ops
    m = jnp.maximum(x, 0.0)
    return m + jnp.log(jnp.exp(x - m) + jnp.exp(-m))


# --------------------------------- kernel -----------------------------------
def bow_vae_kernel(data_ref, eps_ref,
                   w_emb_ref, b_emb_ref,
                   w_e0_ref, b_e0_ref, w_e1_ref, b_e1_ref,
                   w_head_ref, b_head_ref,
                   w_dec_ref, b_dec_ref,
                   out_ref):
    f32 = jnp.float32
    bf16 = jnp.bfloat16

    data = data_ref[...]                                          # (B, V) f32

    # embedding: Linear(V -> E) + Tanh  (bf16 MXU operands, f32 accumulation)
    emb = jnp.tanh(jnp.dot(data.astype(bf16), w_emb_ref[...],
                           preferred_element_type=f32) + b_emb_ref[...])

    # encoder: [Linear -> Softplus -> Dropout] x 2
    # TODO(synk): training-mode dropout (enc_dr, post-sample dropout) omitted;
    #             eval-mode (identity) semantics implemented.
    h = _softplus(jnp.dot(emb.astype(bf16), w_e0_ref[...],
                          preferred_element_type=f32) + b_e0_ref[...])
    h = _softplus(jnp.dot(h.astype(bf16), w_e1_ref[...],
                          preferred_element_type=f32) + b_e1_ref[...])

    # fused mu|logvar head; eval-mode BatchNorm already folded into W/b.
    head = jnp.dot(h.astype(bf16), w_head_ref[...],
                   preferred_element_type=f32) + b_head_ref[...]   # (B, 2*L)
    mu_bn = head[:, :N_LATENT]
    lv_bn = head[:, N_LATENT:]

    # reparameterized sample; share exp(0.5*lv) with the KL variance term
    s = jnp.exp(0.5 * lv_bn)
    z_p = mu_bn + s * eps_ref[...]

    # KL divergence against the logistic-normal prior (prior mean = 0)
    inv_pv = 1.0 / PRIOR_VAR
    kl = 0.5 * (jnp.sum((s * s + mu_bn * mu_bn) * inv_pv
                        + (PRIOR_LOGVAR - lv_bn), axis=1, keepdims=True)
                - N_LATENT)

    # z on the simplex (softmax with approx-reciprocal denominator), decode
    m_z = jnp.max(z_p, axis=-1, keepdims=True)
    e_z = jnp.exp(z_p - m_z)
    z = e_z * pl.reciprocal(jnp.sum(e_z, axis=-1, keepdims=True), approx=True)

    xhat = jnp.dot(z.astype(bf16), w_dec_ref[...],
                   preferred_element_type=f32) + b_dec_ref[...]    # (B, V)

    # log-softmax reconstruction: recon = -sum(data * (xhat - logsumexp(xhat)))
    m_x = jnp.max(xhat, axis=-1, keepdims=True)
    lse = m_x + jnp.log(jnp.sum(jnp.exp(xhat - m_x), axis=-1, keepdims=True))
    recon = (jnp.sum(data, axis=1, keepdims=True) * lse
             - jnp.sum(data * xhat, axis=1, keepdims=True))

    # single lane-dense output: lane 0 = KL, lane 1 = recon, rest zero
    lane = jax.lax.broadcasted_iota(jnp.int32, (BATCH, OUT_LANES), 1)
    out_ref[...] = jnp.where(lane == 0, kl, jnp.where(lane == 1, recon, 0.0))


# ----------------------------- parameter prep -------------------------------
def _fold_bn(w, b, bn, eps):
    """Fold eval-mode BatchNorm1d into a (in, out) linear weight/bias."""
    gamma, beta, mean, var = bn[0], bn[1], bn[2], bn[3]
    scale = gamma / jnp.sqrt(var + eps)
    w_f = w * scale[None, :]
    b_f = (b - mean[None, :]) * scale[None, :] + beta[None, :]
    return w_f, b_f


def prepare_params(p):
    """Fold BN into the mu/lv heads, fuse them, cast MXU weights to bf16."""
    w_mu, b_mu = _fold_bn(p["w_mu"], p["b_mu"], p["mu_bn"], MU_BN_EPS)
    w_lv, b_lv = _fold_bn(p["w_lv"], p["b_lv"], p["lv_bn"], LV_BN_EPS)
    bf16 = jnp.bfloat16
    return {
        "w_emb": p["w_emb"].astype(bf16), "b_emb": p["b_emb"],
        "w_e0": p["w_e0"].astype(bf16),   "b_e0": p["b_e0"],
        "w_e1": p["w_e1"].astype(bf16),   "b_e1": p["b_e1"],
        "w_head": jnp.concatenate([w_mu, w_lv], axis=1).astype(bf16),
        "b_head": jnp.concatenate([b_mu, b_lv], axis=1),
        "w_dec": p["w_dec"].astype(bf16), "b_dec": p["b_dec"],
    }


# --------------------------------- wrapper ----------------------------------
def bow_vae_forward(data, eps, params):
    p = prepare_params(params)

    def full_spec(arr):
        nd = arr.ndim
        return pl.BlockSpec(arr.shape, lambda i, _nd=nd: (0,) * _nd)

    in_arrays = [data, eps,
                 p["w_emb"], p["b_emb"],
                 p["w_e0"], p["b_e0"], p["w_e1"], p["b_e1"],
                 p["w_head"], p["b_head"],
                 p["w_dec"], p["b_dec"]]
    in_specs = [full_spec(a) for a in in_arrays]

    out = pl.pallas_call(
        bow_vae_kernel,
        out_shape=jax.ShapeDtypeStruct((BATCH, OUT_LANES), jnp.float32),
        grid_spec=pltpu.PrefetchScalarGridSpec(
            num_scalar_prefetch=0,
            grid=(1,),                               # whole batch in one step
            in_specs=in_specs,
            out_specs=pl.BlockSpec((BATCH, OUT_LANES), lambda i: (0, 0)),
        ),
        compiler_params=pltpu.CompilerParams(
            dimension_semantics=("arbitrary",)),
    )(*in_arrays)

    kl = out[:, 0]
    recon = out[:, 1]
    ii = kl + recon
    coherence_loss = jnp.zeros_like(ii)
    redundancy_loss = jnp.zeros_like(ii)
    classifier_outputs = None      # n_labels = 0 -> has_classifier is False
    return ii, kl, recon, coherence_loss, redundancy_loss, classifier_outputs


# ------------------------------ pure-JAX reference --------------------------
def bow_vae_reference(data, eps, p):
    def softplus(x):
        return jnp.logaddexp(x, 0.0)
    emb = jnp.tanh(data @ p["w_emb"] + p["b_emb"])
    h = softplus(emb @ p["w_e0"] + p["b_e0"])
    h = softplus(h @ p["w_e1"] + p["b_e1"])
    mu = h @ p["w_mu"] + p["b_mu"]
    lv = h @ p["w_lv"] + p["b_lv"]
    mu_bn = ((mu - p["mu_bn"][2]) / jnp.sqrt(p["mu_bn"][3] + MU_BN_EPS)
             * p["mu_bn"][0] + p["mu_bn"][1])
    lv_bn = ((lv - p["lv_bn"][2]) / jnp.sqrt(p["lv_bn"][3] + LV_BN_EPS)
             * p["lv_bn"][0] + p["lv_bn"][1])
    z_p = mu_bn + jnp.exp(0.5 * lv_bn) * eps
    inv_pv = 1.0 / PRIOR_VAR
    kl = 0.5 * (jnp.sum(jnp.exp(lv_bn) * inv_pv + mu_bn * mu_bn * inv_pv
                        + PRIOR_LOGVAR - lv_bn, axis=1) - N_LATENT)
    z = jax.nn.softmax(z_p, axis=-1)
    y = jax.nn.softmax(z @ p["w_dec"] + p["b_dec"], axis=-1)
    recon = -jnp.sum(data * jnp.log(y + 1e-12), axis=1)
    return kl + recon, kl, recon


# -------------------------------- parameters --------------------------------
def init_params(key):
    def xavier(k, fan_in, fan_out):
        a = math.sqrt(6.0 / (fan_in + fan_out))
        return jax.random.uniform(k, (fan_in, fan_out), jnp.float32, -a, a)

    def bias(k, fan_in, fan_out):
        b = 1.0 / math.sqrt(fan_in)
        return jax.random.uniform(k, (1, fan_out), jnp.float32, -b, b)

    ks = jax.random.split(key, 12)
    # BatchNorm rows: [gamma, beta, running_mean, running_var] (fresh init)
    bn = jnp.stack([jnp.ones((N_LATENT,), jnp.float32),
                    jnp.zeros((N_LATENT,), jnp.float32),
                    jnp.zeros((N_LATENT,), jnp.float32),
                    jnp.ones((N_LATENT,), jnp.float32)], axis=0)
    return {
        "w_emb": xavier(ks[0], VOCAB, EMB),    "b_emb": bias(ks[1], VOCAB, EMB),
        "w_e0": xavier(ks[2], EMB, ENC_DIM),   "b_e0": bias(ks[3], EMB, ENC_DIM),
        "w_e1": xavier(ks[4], ENC_DIM, ENC_DIM), "b_e1": bias(ks[5], ENC_DIM, ENC_DIM),
        "w_mu": xavier(ks[6], ENC_DIM, N_LATENT), "b_mu": bias(ks[7], ENC_DIM, N_LATENT),
        "mu_bn": bn,
        "w_lv": xavier(ks[8], ENC_DIM, N_LATENT), "b_lv": bias(ks[9], ENC_DIM, N_LATENT),
        "lv_bn": bn,
        "w_dec": xavier(ks[10], N_LATENT, VOCAB), "b_dec": bias(ks[11], N_LATENT, VOCAB),
    }


if __name__ == "__main__":
    key = jax.random.PRNGKey(0)
    k_data, k_eps, k_params = jax.random.split(key, 3)

    # bag-of-words counts (dense) and reparameterization noise
    data = jax.random.poisson(k_data, 0.3, (BATCH, VOCAB)).astype(jnp.float32)
    eps = jax.random.normal(k_eps, (BATCH, N_LATENT), jnp.float32)
    params = init_params(k_params)

    ii, kl, recon, coh, red, clf = bow_vae_forward(data, eps, params)
    jax.block_until_ready((ii, kl, recon))

    ii_ref, kl_ref, recon_ref = bow_vae_reference(data, eps, params)
    assert ii.shape == (BATCH,) and kl.shape == (BATCH,) and recon.shape == (BATCH,)
    assert clf is None
    assert jnp.allclose(kl, kl_ref, rtol=3e-2, atol=5e-1), (kl, kl_ref)
    assert jnp.allclose(recon, recon_ref, rtol=3e-2, atol=5e-1), (recon, recon_ref)
    assert jnp.allclose(ii, ii_ref, rtol=3e-2, atol=5e-1), (ii, ii_ref)

    print("KERNEL_OK")
</pallas_src>

<mosaic_0001>
module attributes {stable_mosaic.version = 11 : i64} {
  func.func @bow_vae_kernel(%arg0: i32, %arg1: memref<16x256xf32, #tpu.memory_space<vmem>>, %arg2: memref<16x32xf32, #tpu.memory_space<vmem>>, %arg3: memref<256x128xbf16, #tpu.memory_space<vmem>>, %arg4: memref<1x128xf32, #tpu.memory_space<vmem>>, %arg5: memref<128x128xbf16, #tpu.memory_space<vmem>>, %arg6: memref<1x128xf32, #tpu.memory_space<vmem>>, %arg7: memref<128x128xbf16, #tpu.memory_space<vmem>>, %arg8: memref<1x128xf32, #tpu.memory_space<vmem>>, %arg9: memref<128x64xbf16, #tpu.memory_space<vmem>>, %arg10: memref<1x64xf32, #tpu.memory_space<vmem>>, %arg11: memref<32x256xbf16, #tpu.memory_space<vmem>>, %arg12: memref<1x256xf32, #tpu.memory_space<vmem>>, %arg13: memref<16x128xf32, #tpu.memory_space<vmem>>) attributes {dimension_semantics = [#tpu.dimension_semantics<arbitrary>], iteration_bounds = array<i64: 1>, scalar_prefetch = 0 : i64, scratch_operands = 0 : i64, tpu.core_type = #tpu.core_type<tc>, window_params = [{pipeline_mode = #tpu.pipeline_mode<synchronous>, transform_indices = @transform_0, window_bounds = array<i64: 16, 256>}, {pipeline_mode = #tpu.pipeline_mode<synchronous>, transform_indices = @transform_1, window_bounds = array<i64: 16, 32>}, {pipeline_mode = #tpu.pipeline_mode<synchronous>, transform_indices = @transform_2, window_bounds = array<i64: 256, 128>}, {pipeline_mode = #tpu.pipeline_mode<synchronous>, transform_indices = @transform_3, window_bounds = array<i64: 1, 128>}, {pipeline_mode = #tpu.pipeline_mode<synchronous>, transform_indices = @transform_4, window_bounds = array<i64: 128, 128>}, {pipeline_mode = #tpu.pipeline_mode<synchronous>, transform_indices = @transform_5, window_bounds = array<i64: 1, 128>}, {pipeline_mode = #tpu.pipeline_mode<synchronous>, transform_indices = @transform_6, window_bounds = array<i64: 128, 128>}, {pipeline_mode = #tpu.pipeline_mode<synchronous>, transform_indices = @transform_7, window_bounds = array<i64: 1, 128>}, {pipeline_mode = #tpu.pipeline_mode<synchronous>, transform_indices = @transform_8, window_bounds = array<i64: 128, 64>}, {pipeline_mode = #tpu.pipeline_mode<synchronous>, transform_indices = @transform_9, window_bounds = array<i64: 1, 64>}, {pipeline_mode = #tpu.pipeline_mode<synchronous>, transform_indices = @transform_10, window_bounds = array<i64: 32, 256>}, {pipeline_mode = #tpu.pipeline_mode<synchronous>, transform_indices = @transform_11, window_bounds = array<i64: 1, 256>}, {pipeline_mode = #tpu.pipeline_mode<synchronous>, transform_indices = @transform_12, window_bounds = array<i64: 16, 128>}]} {
    %c0 = arith.constant 0 : index
    %c0_0 = arith.constant 0 : index
    %0 = vector.load %arg1[%c0, %c0_0] : memref<16x256xf32, #tpu.memory_space<vmem>>, vector<16x256xf32>
    %1 = arith.truncf %0 : vector<16x256xf32> to vector<16x256xbf16>
    %c0_1 = arith.constant 0 : index
    %c0_2 = arith.constant 0 : index
    %2 = vector.load %arg3[%c0_1, %c0_2] : memref<256x128xbf16, #tpu.memory_space<vmem>>, vector<256x128xbf16>
    %cst = arith.constant dense<0.000000e+00> : vector<16x128xf32>
    %3 = tpu.matmul %1, %2, %cst {dimension_numbers = #tpu.dot_dimension_numbers<[1], [0], [0], [1], [0, 0, 1, 1], [], []>} : vector<16x256xbf16>, vector<256x128xbf16>, vector<16x128xf32> -> vector<16x128xf32>
    %c0_3 = arith.constant 0 : index
    %c0_4 = arith.constant 0 : index
    %4 = vector.load %arg4[%c0_3, %c0_4] : memref<1x128xf32, #tpu.memory_space<vmem>>, vector<1x128xf32>
    %5 = vector.broadcast %4 : vector<1x128xf32> to vector<16x128xf32>
    %6 = arith.addf %3, %5 : vector<16x128xf32>
    %7 = math.tanh %6 : vector<16x128xf32>
    %8 = arith.truncf %7 : vector<16x128xf32> to vector<16x128xbf16>
    %c0_5 = arith.constant 0 : index
    %c0_6 = arith.constant 0 : index
    %9 = vector.load %arg5[%c0_5, %c0_6] : memref<128x128xbf16, #tpu.memory_space<vmem>>, vector<128x128xbf16>
    %cst_7 = arith.constant dense<0.000000e+00> : vector<16x128xf32>
    %10 = tpu.matmul %8, %9, %cst_7 {dimension_numbers = #tpu.dot_dimension_numbers<[1], [0], [0], [1], [0, 0, 1, 1], [], []>} : vector<16x128xbf16>, vector<128x128xbf16>, vector<16x128xf32> -> vector<16x128xf32>
    %c0_8 = arith.constant 0 : index
    %c0_9 = arith.constant 0 : index
    %11 = vector.load %arg6[%c0_8, %c0_9] : memref<1x128xf32, #tpu.memory_space<vmem>>, vector<1x128xf32>
    %12 = vector.broadcast %11 : vector<1x128xf32> to vector<16x128xf32>
    %13 = arith.addf %10, %12 : vector<16x128xf32>
    %cst_10 = arith.constant 0.000000e+00 : f32
    %14 = vector.broadcast %cst_10 : f32 to vector<16x128xf32>
    %15 = arith.maximumf %13, %14 : vector<16x128xf32>
    %16 = arith.subf %13, %15 : vector<16x128xf32>
    %17 = math.exp %16 : vector<16x128xf32>
    %cst_11 = arith.constant 0.000000e+00 : f32
    %18 = vector.broadcast %cst_11 : f32 to vector<16x128xf32>
    %19 = arith.subf %18, %15 : vector<16x128xf32>
    %20 = math.exp %19 : vector<16x128xf32>
    %21 = arith.addf %17, %20 : vector<16x128xf32>
    %22 = math.log %21 : vector<16x128xf32>
    %23 = arith.addf %15, %22 : vector<16x128xf32>
    %24 = arith.truncf %23 : vector<16x128xf32> to vector<16x128xbf16>
    %c0_12 = arith.constant 0 : index
    %c0_13 = arith.constant 0 : index
    %25 = vector.load %arg7[%c0_12, %c0_13] : memref<128x128xbf16, #tpu.memory_space<vmem>>, vector<128x128xbf16>
    %cst_14 = arith.constant dense<0.000000e+00> : vector<16x128xf32>
    %26 = tpu.matmul %24, %25, %cst_14 {dimension_numbers = #tpu.dot_dimension_numbers<[1], [0], [0], [1], [0, 0, 1, 1], [], []>} : vector<16x128xbf16>, vector<128x128xbf16>, vector<16x128xf32> -> vector<16x128xf32>
    %c0_15 = arith.constant 0 : index
    %c0_16 = arith.constant 0 : index
    %27 = vector.load %arg8[%c0_15, %c0_16] : memref<1x128xf32, #tpu.memory_space<vmem>>, vector<1x128xf32>
    %28 = vector.broadcast %27 : vector<1x128xf32> to vector<16x128xf32>
    %29 = arith.addf %26, %28 : vector<16x128xf32>
    %cst_17 = arith.constant 0.000000e+00 : f32
    %30 = vector.broadcast %cst_17 : f32 to vector<16x128xf32>
    %31 = arith.maximumf %29, %30 : vector<16x128xf32>
    %32 = arith.subf %29, %31 : vector<16x128xf32>
    %33 = math.exp %32 : vector<16x128xf32>
    %cst_18 = arith.constant 0.000000e+00 : f32
    %34 = vector.broadcast %cst_18 : f32 to vector<16x128xf32>
    %35 = arith.subf %34, %31 : vector<16x128xf32>
    %36 = math.exp %35 : vector<16x128xf32>
    %37 = arith.addf %33, %36 : vector<16x128xf32>
    %38 = math.log %37 : vector<16x128xf32>
    %39 = arith.addf %31, %38 : vector<16x128xf32>
    %40 = arith.truncf %39 : vector<16x128xf32> to vector<16x128xbf16>
    %c0_19 = arith.constant 0 : index
    %c0_20 = arith.constant 0 : index
    %41 = vector.load %arg9[%c0_19, %c0_20] : memref<128x64xbf16, #tpu.memory_space<vmem>>, vector<128x64xbf16>
    %cst_21 = arith.constant dense<0.000000e+00> : vector<16x64xf32>
    %42 = tpu.matmul %40, %41, %cst_21 {dimension_numbers = #tpu.dot_dimension_numbers<[1], [0], [0], [1], [0, 0, 1, 1], [], []>} : vector<16x128xbf16>, vector<128x64xbf16>, vector<16x64xf32> -> vector<16x64xf32>
    %c0_22 = arith.constant 0 : index
    %c0_23 = arith.constant 0 : index
    %43 = vector.load %arg10[%c0_22, %c0_23] : memref<1x64xf32, #tpu.memory_space<vmem>>, vector<1x64xf32>
    %44 = vector.broadcast %43 : vector<1x64xf32> to vector<16x64xf32>
    %45 = arith.addf %42, %44 : vector<16x64xf32>
    %46 = vector.extract_strided_slice %45 {offsets = [0, 0], sizes = [16, 32], strides = [1, 1]} : vector<16x64xf32> to vector<16x32xf32>
    %47 = vector.extract_strided_slice %45 {offsets = [0, 32], sizes = [16, 32], strides = [1, 1]} : vector<16x64xf32> to vector<16x32xf32>
    %cst_24 = arith.constant 5.000000e-01 : f32
    %48 = vector.broadcast %cst_24 : f32 to vector<16x32xf32>
    %49 = arith.mulf %48, %47 : vector<16x32xf32>
    %50 = math.exp %49 : vector<16x32xf32>
    %c0_25 = arith.constant 0 : index
    %c0_26 = arith.constant 0 : index
    %51 = vector.load %arg2[%c0_25, %c0_26] : memref<16x32xf32, #tpu.memory_space<vmem>>, vector<16x32xf32>
    %52 = arith.mulf %50, %51 : vector<16x32xf32>
    %53 = arith.addf %46, %52 : vector<16x32xf32>
    %54 = arith.mulf %50, %50 : vector<16x32xf32>
    %55 = arith.mulf %46, %46 : vector<16x32xf32>
    %56 = arith.addf %54, %55 : vector<16x32xf32>
    %cst_27 = arith.constant 1.06555676 : f32
    %57 = vector.broadcast %cst_27 : f32 to vector<16x32xf32>
    %58 = arith.mulf %56, %57 : vector<16x32xf32>
    %cst_28 = arith.constant -0.0634973943 : f32
    %59 = vector.broadcast %cst_28 : f32 to vector<16x32xf32>
    %60 = arith.subf %59, %47 : vector<16x32xf32>
    %61 = arith.addf %58, %60 : vector<16x32xf32>
    %cst_29 = arith.constant dense<0.000000e+00> : vector<16xf32>
    %62 = vector.multi_reduction <add>, %61, %cst_29 [1] : vector<16x32xf32> to vector<16xf32>
    %63 = vector.shape_cast %62 : vector<16xf32> to vector<16x1xf32>
    %cst_30 = arith.constant 3.200000e+01 : f32
    %64 = vector.broadcast %cst_30 : f32 to vector<16x1xf32>
    %65 = arith.subf %63, %64 : vector<16x1xf32>
    %cst_31 = arith.constant 5.000000e-01 : f32
    %66 = vector.broadcast %cst_31 : f32 to vector<16x1xf32>
    %67 = arith.mulf %66, %65 : vector<16x1xf32>
    %cst_32 = arith.constant dense<0xFF800000> : vector<16xf32>
    %68 = vector.multi_reduction <maximumf>, %53, %cst_32 [1] : vector<16x32xf32> to vector<16xf32>
    %69 = vector.shape_cast %68 : vector<16xf32> to vector<16x1xf32>
    %70 = vector.broadcast %69 : vector<16x1xf32> to vector<16x32xf32>
    %71 = arith.subf %53, %70 : vector<16x32xf32>
    %72 = math.exp %71 : vector<16x32xf32>
    %cst_33 = arith.constant dense<0.000000e+00> : vector<16xf32>
    %73 = vector.multi_reduction <add>, %72, %cst_33 [1] : vector<16x32xf32> to vector<16xf32>
    %74 = vector.shape_cast %73 : vector<16xf32> to vector<16x1xf32>
    %75 = tpu.reciprocal %74 {approx = true} : vector<16x1xf32> -> vector<16x1xf32>
    %76 = vector.broadcast %75 : vector<16x1xf32> to vector<16x32xf32>
    %77 = arith.mulf %72, %76 : vector<16x32xf32>
    %78 = arith.truncf %77 : vector<16x32xf32> to vector<16x32xbf16>
    %c0_34 = arith.constant 0 : index
    %c0_35 = arith.constant 0 : index
    %79 = vector.load %arg11[%c0_34, %c0_35] : memref<32x256xbf16, #tpu.memory_space<vmem>>, vector<32x256xbf16>
    %cst_36 = arith.constant dense<0.000000e+00> : vector<16x256xf32>
    %80 = tpu.matmul %78, %79, %cst_36 {dimension_numbers = #tpu.dot_dimension_numbers<[1], [0], [0], [1], [0, 0, 1, 1], [], []>} : vector<16x32xbf16>, vector<32x256xbf16>, vector<16x256xf32> -> vector<16x256xf32>
    %c0_37 = arith.constant 0 : index
    %c0_38 = arith.constant 0 : index
    %81 = vector.load %arg12[%c0_37, %c0_38] : memref<1x256xf32, #tpu.memory_space<vmem>>, vector<1x256xf32>
    %82 = vector.broadcast %81 : vector<1x256xf32> to vector<16x256xf32>
    %83 = arith.addf %80, %82 : vector<16x256xf32>
    %cst_39 = arith.constant dense<0xFF800000> : vector<16xf32>
    %84 = vector.multi_reduction <maximumf>, %83, %cst_39 [1] : vector<16x256xf32> to vector<16xf32>
    %85 = vector.shape_cast %84 : vector<16xf32> to vector<16x1xf32>
    %86 = vector.broadcast %85 : vector<16x1xf32> to vector<16x256xf32>
    %87 = arith.subf %83, %86 : vector<16x256xf32>
    %88 = math.exp %87 : vector<16x256xf32>
    %cst_40 = arith.constant dense<0.000000e+00> : vector<16xf32>
    %89 = vector.multi_reduction <add>, %88, %cst_40 [1] : vector<16x256xf32> to vector<16xf32>
    %90 = vector.shape_cast %89 : vector<16xf32> to vector<16x1xf32>
    %91 = math.log %90 : vector<16x1xf32>
    %92 = arith.addf %85, %91 : vector<16x1xf32>
    %cst_41 = arith.constant dense<0.000000e+00> : vector<16xf32>
    %93 = vector.multi_reduction <add>, %0, %cst_41 [1] : vector<16x256xf32> to vector<16xf32>
    %94 = vector.shape_cast %93 : vector<16xf32> to vector<16x1xf32>
    %95 = arith.mulf %94, %92 : vector<16x1xf32>
    %96 = arith.mulf %0, %83 : vector<16x256xf32>
    %cst_42 = arith.constant dense<0.000000e+00> : vector<16xf32>
    %97 = vector.multi_reduction <add>, %96, %cst_42 [1] : vector<16x256xf32> to vector<16xf32>
    %98 = vector.shape_cast %97 : vector<16xf32> to vector<16x1xf32>
    %99 = arith.subf %95, %98 : vector<16x1xf32>
    %100 = tpu.iota {dimensions = array<i32: 1>} : vector<16x128xi32>
    %c0_i32 = arith.constant 0 : i32
    %101 = vector.broadcast %c0_i32 : i32 to vector<16x128xi32>
    %102 = arith.cmpi eq, %100, %101 : vector<16x128xi32>
    %c1_i32 = arith.constant 1 : i32
    %103 = vector.broadcast %c1_i32 : i32 to vector<16x128xi32>
    %104 = arith.cmpi eq, %100, %103 : vector<16x128xi32>
    %cst_43 = arith.constant 0.000000e+00 : f32
    %105 = vector.shape_cast %99 : vector<16x1xf32> to vector<16x1xf32>
    %106 = vector.broadcast %105 : vector<16x1xf32> to vector<16x128xf32>
    %107 = vector.broadcast %cst_43 : f32 to vector<16x128xf32>
    %108 = arith.select %104, %106, %107 : vector<16x128xi1>, vector<16x128xf32>
    %109 = vector.shape_cast %67 : vector<16x1xf32> to vector<16x1xf32>
    %110 = vector.broadcast %109 : vector<16x1xf32> to vector<16x128xf32>
    %111 = arith.select %102, %110, %108 : vector<16x128xi1>, vector<16x128xf32>
    %c0_44 = arith.constant 0 : index
    %c0_45 = arith.constant 0 : index
    %112 = vector.load %arg13[%c0_44, %c0_45] : memref<16x128xf32, #tpu.memory_space<vmem>>, vector<16x128xf32>
    tpu.vector_store %arg13[%c0_44, %c0_45], %111 {strides = array<i32>} : memref<16x128xf32, #tpu.memory_space<vmem>>, vector<16x128xf32>,
    return
  }
  func.func @transform_0(%arg0: i32) -> (i32, i32) {
    %c0_i32 = arith.constant 0 : i32
    %c0_i32_0 = arith.constant 0 : i32
    %c0_i32_1 = arith.constant 0 : i32
    return %c0_i32, %c0_i32_0 : i32, i32
  }
  func.func @transform_1(%arg0: i32) -> (i32, i32) {
    %c0_i32 = arith.constant 0 : i32
    %c0_i32_0 = arith.constant 0 : i32
    %c0_i32_1 = arith.constant 0 : i32
    return %c0_i32, %c0_i32_0 : i32, i32
  }
  func.func @transform_2(%arg0: i32) -> (i32, i32) {
    %c0_i32 = arith.constant 0 : i32
    %c0_i32_0 = arith.constant 0 : i32
    %c0_i32_1 = arith.constant 0 : i32
    return %c0_i32, %c0_i32_0 : i32, i32
  }
  func.func @transform_3(%arg0: i32) -> (i32, i32) {
    %c0_i32 = arith.constant 0 : i32
    %c0_i32_0 = arith.constant 0 : i32
    %c0_i32_1 = arith.constant 0 : i32
    return %c0_i32, %c0_i32_0 : i32, i32
  }
  func.func @transform_4(%arg0: i32) -> (i32, i32) {
    %c0_i32 = arith.constant 0 : i32
    %c0_i32_0 = arith.constant 0 : i32
    %c0_i32_1 = arith.constant 0 : i32
    return %c0_i32, %c0_i32_0 : i32, i32
  }
  func.func @transform_5(%arg0: i32) -> (i32, i32) {
    %c0_i32 = arith.constant 0 : i32
    %c0_i32_0 = arith.constant 0 : i32
    %c0_i32_1 = arith.constant 0 : i32
    return %c0_i32, %c0_i32_0 : i32, i32
  }
  func.func @transform_6(%arg0: i32) -> (i32, i32) {
    %c0_i32 = arith.constant 0 : i32
    %c0_i32_0 = arith.constant 0 : i32
    %c0_i32_1 = arith.constant 0 : i32
    return %c0_i32, %c0_i32_0 : i32, i32
  }
  func.func @transform_7(%arg0: i32) -> (i32, i32) {
    %c0_i32 = arith.constant 0 : i32
    %c0_i32_0 = arith.constant 0 : i32
    %c0_i32_1 = arith.constant 0 : i32
    return %c0_i32, %c0_i32_0 : i32, i32
  }
  func.func @transform_8(%arg0: i32) -> (i32, i32) {
    %c0_i32 = arith.constant 0 : i32
    %c0_i32_0 = arith.constant 0 : i32
    %c0_i32_1 = arith.constant 0 : i32
    return %c0_i32, %c0_i32_0 : i32, i32
  }
  func.func @transform_9(%arg0: i32) -> (i32, i32) {
    %c0_i32 = arith.constant 0 : i32
    %c0_i32_0 = arith.constant 0 : i32
    %c0_i32_1 = arith.constant 0 : i32
    return %c0_i32, %c0_i32_0 : i32, i32
  }
  func.func @transform_10(%arg0: i32) -> (i32, i32) {
    %c0_i32 = arith.constant 0 : i32
    %c0_i32_0 = arith.constant 0 : i32
    %c0_i32_1 = arith.constant 0 : i32
    return %c0_i32, %c0_i32_0 : i32, i32
  }
  func.func @transform_11(%arg0: i32) -> (i32, i32) {
    %c0_i32 = arith.constant 0 : i32
    %c0_i32_0 = arith.constant 0 : i32
    %c0_i32_1 = arith.constant 0 : i32
    return %c0_i32, %c0_i32_0 : i32, i32
  }
  func.func @transform_12(%arg0: i32) -> (i32, i32) {
    %c0_i32 = arith.constant 0 : i32
    %c0_i32_0 = arith.constant 0 : i32
    %c0_i32_1 = arith.constant 0 : i32
    return %c0_i32, %c0_i32_0 : i32, i32
  }
}

</mosaic_0001>

<bundles_post_ra>
// kernel: tpu_custom_call.1
= control target key start
LH: loop header
LB: loop body
LE: loop exit
PB: predicated region body
PF: predicated region fallthrough
CT: control target
= control target key end

     0   :  { %17 = vsyncpa [#allocation3], 0  ;;  %s1773_s0 = inlined_call_operand.vmem [shape: f32[16,256], index: 0, kind: input, shape index: {}]   ;;  %s1774_s1 = inlined_call_operand.hbm [shape: f32[16,32], index: 1, kind: input, shape index: {}]   ;;  %s1775_s2 = inlined_call_operand.hbm [shape: bf16[256,128], index: 2, kind: input, shape index: {}]   ;;  %s1776_s3 = inlined_call_operand.hbm [shape: f32[1,128], index: 3, kind: input, shape index: {}]   ;;  %s1777_s4 = inlined_call_operand.vmem [shape: bf16[128,128], index: 4, kind: input, shape index: {}]   ;;  %s1778_s5 = inlined_call_operand.hbm [shape: f32[1,128], index: 5, kind: input, shape index: {}]   ;;  %s1779_s6 = inlined_call_operand.hbm [shape: bf16[128,128], index: 6, kind: input, shape index: {}]   ;;  %s1780_s7 = inlined_call_operand.hbm [shape: f32[1,128], index: 7, kind: input, shape index: {}]   ;;  %s1781_s8 = inlined_call_operand.vmem [shape: bf16[128,64], index: 8, kind: input, shape index: {}]   ;;  %s1782_s9 = inlined_call_operand.hbm [shape: f32[1,64], index: 9, kind: input, shape index: {}]   ;;  %s1783_s10 = inlined_call_operand.vmem [shape: bf16[32,256], index: 10, kind: input, shape index: {}]   ;;  %s1784_s11 = inlined_call_operand.vmem [shape: f32[1,256], index: 11, kind: input, shape index: {}]   ;;  %s1785_s12 = inlined_call_operand.hbm [shape: f32[16,128], index: 12, kind: output, shape index: {}]  }
   0x1   :  { %18 = vsyncpa [#allocation6], 0 }
   0x2   :  { %19 = vsyncpa [#allocation9], 0 }
   0x3   :  { %20 = vsyncpa [#allocation12], 0 }
   0x4   :  { %21 = vsyncpa [#allocation4], 0  ;;  %s1410_s21 = smov [#allocation5]   ;;  %s1224_s25 = scalar_lea.hbm %s1775_s2, 2048 }
   0x5   :  { %s41_s22 = sshll.u32 %s1410_s21, 4  ;;  %p1225_p0 = scmp.ne.s32.totalorder %s1775_s2, %s1224_s25  ;;  %s42_s22 = int_to_ptr.vmem [resolvable:$true] %s41_s22 }
   0x6   :  { %p1228_p1 = scmp.lt.u32.totalorder %s1224_s25, %s1775_s2 }
   0x8   :  { %p1230_p2 = pnand %p1228_p1, %p1225_p0 }
   0xa   :  { %1233 = shalt.err (!%p1230_p2)
}
   0xb   :  { %s1234_s30 = scalar_lea.vmem %s42_s22, 2048  ;;  %p1239_p4 = scmp.lt.s32.totalorder %s42_s22, %s42_s22 }
   0xc   :  { %p1235_p3 = scmp.ne.s32.totalorder %s42_s22, %s1234_s30  ;;  %p1240_p5 = scmp.lt.s32.totalorder %s1234_s30, %s1234_s30 }
   0xe   :  { %p1241_p6 = por %p1240_p5, %p1239_p4 }
  0x10   :  { %p1242_p7 = pnand %p1241_p6, %p1235_p3 }
  0x12   :  { %1245 = shalt.err (!%p1242_p7)
}
  0x13   :  { %s1411_s13 = smov 64   ;;  %s1412_s14 = smov 4  }
  0x14   :  { %47 = dma.hbm_to_vmem [thread:$0]  %s1775_s2, 2048, %s42_s22, [#allocation6], %s1411_s13, %s1411_s13, %s1412_s14  }
  0x15   :  { %s1413_s17 = smov [#allocation8]   ;;  %s1414_s19 = smov [#allocation11]  }
  0x16   :  { %s66_s18 = sshll.u32 %s1413_s17, 4  ;;  %s88_s20 = sshll.u32 %s1414_s19, 4  ;;  %s67_s18 = int_to_ptr.vmem [resolvable:$true] %s66_s18  ;;  %s89_s20 = int_to_ptr.vmem [resolvable:$true] %s88_s20 }
  0x17   :  { %s1246_s24 = scalar_lea.hbm %s1778_s5, 16 }
  0x18   :  { %p1247_p8 = scmp.ne.s32.totalorder %s1778_s5, %s1246_s24  ;;  %p1250_p9 = scmp.lt.u32.totalorder %s1246_s24, %s1778_s5 }
  0x1a   :  { %p1252_p10 = pnand %p1250_p9, %p1247_p8 }
  0x1c   :  { %1255 = shalt.err (!%p1252_p10)
}
  0x1d   :  { %s1256_s2 = scalar_lea.vmem %s67_s18, 16  ;;  %s1260_s22 = scalar_lea.vmem %s67_s18, 32 }
  0x1e   :  { %p1257_p11 = scmp.ne.s32.totalorder %s67_s18, %s1256_s2  ;;  %p1261_p12 = scmp.lt.s32.totalorder %s67_s18, %s67_s18 }
  0x1f   :  { %p1262_p13 = scmp.lt.s32.totalorder %s1260_s22, %s1256_s2 }
  0x21   :  { %p1263_p0 = por %p1262_p13, %p1261_p12 }
  0x23   :  { %p1264_p1 = pnand %p1263_p0, %p1257_p11 }
  0x25   :  { %1267 = shalt.err (!%p1264_p1)
}
  0x26   :  { %69 = dma.hbm_to_vmem [thread:$0]  %s1778_s5, 16, %s67_s18, [#allocation9]  }
  0x27   :  { %s1268_s17 = scalar_lea.hbm %s1780_s7, 16 }
  0x28   :  { %p1269_p2 = scmp.ne.s32.totalorder %s1780_s7, %s1268_s17  ;;  %p1272_p3 = scmp.lt.u32.totalorder %s1268_s17, %s1780_s7 }
  0x2a   :  { %p1274_p4 = pnand %p1272_p3, %p1269_p2 }
  0x2c   :  { %1277 = shalt.err (!%p1274_p4)
}
  0x2d   :  { %s1278_s25 = scalar_lea.vmem %s89_s20, 16  ;;  %s1282_s26 = scalar_lea.vmem %s89_s20, 32 }
  0x2e   :  { %p1279_p5 = scmp.ne.s32.totalorder %s89_s20, %s1278_s25  ;;  %p1283_p6 = scmp.lt.s32.totalorder %s89_s20, %s89_s20 }
  0x2f   :  { %p1284_p7 = scmp.lt.s32.totalorder %s1282_s26, %s1278_s25 }
  0x31   :  { %p1285_p8 = por %p1284_p7, %p1283_p6 }
  0x33   :  { %p1286_p9 = pnand %p1285_p8, %p1279_p5 }
  0x35   :  { %1289 = shalt.err (!%p1286_p9)
}
  0x36   :  { %91 = dma.hbm_to_vmem [thread:$0]  %s1780_s7, 16, %s89_s20, [#allocation12]  }
  0x37   :  { %s1415_s27 = smov [#allocation2]   ;;  %s1290_s29 = scalar_lea.hbm %s1774_s1, 256 }
  0x38   :  { %s29_s28 = sshll.u32 %s1415_s27, 4  ;;  %p1291_p10 = scmp.ne.s32.totalorder %s1774_s1, %s1290_s29  ;;  %s30_s28 = int_to_ptr.vmem [resolvable:$true] %s29_s28 }
  0x39   :  { %p1294_p11 = scmp.lt.u32.totalorder %s1290_s29, %s1774_s1 }
  0x3b   :  { %p1296_p12 = pnand %p1294_p11, %p1291_p10 }
  0x3d   :  { %1299 = shalt.err (!%p1296_p12)
}
  0x3e   :  { %s1300_s19 = scalar_lea.vmem %s30_s28, 256  ;;  %p1305_p0 = scmp.lt.s32.totalorder %s30_s28, %s30_s28 }
  0x3f   :  { %p1301_p13 = scmp.ne.s32.totalorder %s30_s28, %s1300_s19  ;;  %p1306_p1 = scmp.lt.s32.totalorder %s1300_s19, %s1300_s19 }
  0x41   :  { %p1307_p2 = por %p1306_p1, %p1305_p0 }
  0x43   :  { %p1308_p3 = pnand %p1307_p2, %p1301_p13 }
  0x45   :  { %1311 = shalt.err (!%p1308_p3)
}
  0x46   :  { %s1416_s7 = smov 128   ;;  %s1417_s20 = smov 8  }
  0x47   :  { %35 = dma.hbm_to_vmem [thread:$0]  %s1774_s1, 256, %s30_s28, [#allocation3], %s1416_s7, %s1416_s7, %s1417_s20  }
  0x48   :  { %s1418_s24 = smov [#allocation7]   ;;  %s1419_s26 = smov [#allocation10]  }
  0x49   :  { %s54_s25 = sshll.u32 %s1418_s24, 4  ;;  %s75_s5 = sshll.u32 %s1419_s26, 4  ;;  %s55_s25 = int_to_ptr.vmem [resolvable:$true] %s54_s25  ;;  %s1546_s5 = int_to_ptr.vmem [resolvable:$true] %s75_s5 }
  0x4a   :  { %s1312_s2 = scalar_lea.hbm %s1776_s3, 16 }
  0x4b   :  { %p1313_p4 = scmp.ne.s32.totalorder %s1776_s3, %s1312_s2  ;;  %p1316_p5 = scmp.lt.u32.totalorder %s1312_s2, %s1776_s3 }
  0x4d   :  { %p1318_p6 = pnand %p1316_p5, %p1313_p4 }
  0x4f   :  { %1321 = shalt.err (!%p1318_p6)
}
  0x50   :  { %s1322_s1 = scalar_lea.vmem %s55_s25, 16  ;;  %s1326_s28 = scalar_lea.vmem %s55_s25, 32 }
  0x51   :  { %p1323_p7 = scmp.ne.s32.totalorder %s55_s25, %s1322_s1  ;;  %p1327_p8 = scmp.lt.s32.totalorder %s55_s25, %s55_s25 }
  0x52   :  { %p1328_p9 = scmp.lt.s32.totalorder %s1326_s28, %s1322_s1 }
  0x54   :  { %p1329_p10 = por %p1328_p9, %p1327_p8 }
  0x56   :  { %p1330_p11 = pnand %p1329_p10, %p1323_p7 }
  0x58   :  { %1333 = shalt.err (!%p1330_p11)
}
  0x59   :  { %57 = dma.hbm_to_vmem [thread:$0]  %s1776_s3, 16, %s55_s25, [#allocation6]  }
  0x5a   :  { %s1334_s23 = scalar_lea.hbm %s1779_s6, 1024 }
  0x5b   :  { %p1335_p12 = scmp.ne.s32.totalorder %s1779_s6, %s1334_s23  ;;  %p1338_p13 = scmp.lt.u32.totalorder %s1334_s23, %s1779_s6 }
  0x5d   :  { %p1340_p0 = pnand %p1338_p13, %p1335_p12 }
  0x5f   :  { %1343 = shalt.err (!%p1340_p0)
}
  0x60   :  { %s1344_s2 = scalar_lea.vmem %s1546_s5, 1024  ;;  %p1349_p2 = scmp.lt.s32.totalorder %s1546_s5, %s1546_s5 }
  0x61   :  { %p1345_p1 = scmp.ne.s32.totalorder %s1546_s5, %s1344_s2  ;;  %p1350_p3 = scmp.lt.s32.totalorder %s1344_s2, %s1344_s2 }
  0x63   :  { %p1351_p4 = por %p1350_p3, %p1349_p2 }
  0x65   :  { %p1352_p5 = pnand %p1351_p4, %p1345_p1 }
  0x67   :  { %1355 = shalt.err (!%p1352_p5)
}
  0x68   :  { %81 = dma.hbm_to_vmem [thread:$0]  %s1779_s6, 1024, %s1546_s5, [#allocation9], %s1411_s13, %s1411_s13, %s1412_s14  }
  0x69   :  { %s1420_s22 = smov [#allocation13]   ;;  %s1356_s1 = scalar_lea.hbm %s1782_s9, 16 }
  0x6a   :  { %s100_s29 = sshll.u32 %s1420_s22, 4  ;;  %p1357_p6 = scmp.ne.s32.totalorder %s1782_s9, %s1356_s1  ;;  %s101_s29 = int_to_ptr.vmem [resolvable:$true] %s100_s29 }
  0x6b   :  { %p1360_p7 = scmp.lt.u32.totalorder %s1356_s1, %s1782_s9 }
  0x6d   :  { %p1362_p8 = pnand %p1360_p7, %p1357_p6 }
  0x6f   :  { %1365 = shalt.err (!%p1362_p8)
}
  0x70   :  { %s1366_s21 = scalar_lea.vmem %s101_s29, 16  ;;  %s1370_s6 = scalar_lea.vmem %s101_s29, 32 }
  0x71   :  { %p1367_p9 = scmp.ne.s32.totalorder %s101_s29, %s1366_s21  ;;  %p1371_p10 = scmp.lt.s32.totalorder %s101_s29, %s101_s29 }
  0x72   :  { %p1372_p11 = scmp.lt.s32.totalorder %s1370_s6, %s1366_s21 }
  0x74   :  { %p1373_p12 = por %p1372_p11, %p1371_p10 }
  0x76   :  { %p1374_p13 = pnand %p1373_p12, %p1367_p9 }
  0x78   :  { %1377 = shalt.err (!%p1374_p13)
}
  0x79   :  { %103 = dma.hbm_to_vmem [thread:$0]  %s1782_s9, 16, %s101_s29, [#allocation12]  }
  0x7a   :  { %1400 = dma.done.wait [#allocation3], 256  }
  0x7b   :  { %1401 = vsyncadd [#allocation3], 4294967040 }
  0x7c   :  { %1402 = dma.done.wait [#allocation6], 2064  }
  0x7d   :  { %1403 = vsyncadd [#allocation6], 4294965232 }
  0x7e   :  { %1404 = dma.done.wait [#allocation9], 1040  }
  0x7f   :  { %1405 = vsyncadd [#allocation9], 4294966256 }
  0x80   :  { %1406 = dma.done.wait [#allocation12], 32  }
  0x81   :  { %1407 = vsyncadd [#allocation12], 4294967264  ;;  %v1421_v0 = vmov 0.0   ;;  %v1126_v1 = vld [vmem:[#allocation5 + $0x40] sm:$0xff]   ;;  %v1128_v3 = vld [vmem:[#allocation5 + $0x48] sm:$0xff]   ;;  %vm1422_vm0 = vmmov 0  }
  0x82   :  { %1049 = vmatprep.subr.bf16.mxu1 %v1421_v0  ;;  %v1127_v2 = vld [vmem:[#allocation5] sm:$0xff]   ;;  %1000 = vmatprep.subr.bf16.mxu0 %v1126_v1  ;;  %v1129_v4 = vld [vmem:[#allocation5 + $0x8] sm:$0xff]   ;;  %v1130_v5 = vld [vmem:[#allocation5 + $0x50] sm:$0xff]   ;;  %s1423_s28 = smov 32   ;;  %vm753_vm1 = vcmask 261120  }
  0x83   :  { %1001 = vmatpush3.bf16.msra.mxu0 %v1127_v2  ;;  %v1131_v6 = vld [vmem:[#allocation5 + $0x10] sm:$0xff]   ;;  %v1132_v7 = vld [vmem:[#allocation5 + $0x58] sm:$0xff]   ;;  %v1134_v9 = vld [vmem:[#allocation5 + $0x60] sm:$0xff]   ;;  %1065 = vmatprep.mubr.msk.bf16.mxu1 %vm1422_vm0, %v1421_v0 }
  0x84   :  { %1002 = vmatprep.subr.bf16.mxu0 %v1128_v3  ;;  %v1133_v8 = vld [vmem:[#allocation5 + $0x18] sm:$0xff]   ;;  %v1135_v10 = vld [vmem:[#allocation5 + $0x20] sm:$0xff]   ;;  %v1136_v11 = vld [vmem:[#allocation5 + $0x68] sm:$0xff]  }
  0x85   :  { %v1596_v12 = vld [vmem:[%s1773_s0 + $0x8] sm:$0xff]  ;;  %v1601_v13 = vld [vmem:[%s1773_s0 + $0x18] sm:$0xff]  ;;  %v1142_v16 = vld [vmem:[%s1777_s4] sm:$0xff]  }
  0x86   :  { %v1137_v14 = vld [vmem:[#allocation5 + $0x28] sm:$0xff]   ;;  %v135_v15 = vpack.c.bf16 %v1601_v13, %v1596_v12  ;;  %v1138_v17 = vld [vmem:[#allocation5 + $0x70] sm:$0xff]   ;;  %1050 = vmatpush3.bf16.msra.mxu1 %v1142_v16  ;;  %v1143_v18 = vld [vmem:[%s1777_s4 + $0x8] sm:$0xff]  }
  0x87   :  { %1003 = vmatpush3.bf16.msra.mxu0 %v1129_v4  ;;  %v1139_v19 = vld [vmem:[#allocation5 + $0x30] sm:$0xff]   ;;  %1051 = vmatprep.subr.bf16.mxu1 %v1421_v0  ;;  %v1140_v20 = vld [vmem:[#allocation5 + $0x78] sm:$0xff]   ;;  %v1144_v21 = vld [vmem:[%s1777_s4 + $0x10] sm:$0xff]  }
  0x88   :  { %1004 = vmatprep.subr.bf16.mxu0 %v1130_v5  ;;  %303 = vmatprep.mubr.bf16.mxu0 %v135_v15  ;;  %v1141_v22 = vld [vmem:[#allocation5 + $0x38] sm:$0xff]   ;;  %v1618_v23 = vld [vmem:[%s1773_s0] sm:$0xff]  ;;  %v1623_v24 = vld [vmem:[%s1773_s0 + $0x10] sm:$0xff] }
  0x89   :  { %v134_v25 = vpack.c.bf16 %v1623_v24, %v1618_v23  ;;  %v1145_v26 = vld [vmem:[%s1777_s4 + $0x18] sm:$0xff]   ;;  %v1146_v27 = vld [vmem:[%s1777_s4 + $0x20] sm:$0xff]   ;;  %v1147_v28 = vld [vmem:[%s1777_s4 + $0x28] sm:$0xff]  }
  0x8a   :  { %1052 = vmatpush3.bf16.msra.mxu1 %v1143_v18  ;;  %v1148_v29 = vld [vmem:[%s1777_s4 + $0x30] sm:$0xff]   ;;  %v1149_v30 = vld [vmem:[%s1777_s4 + $0x38] sm:$0xff]   ;;  %v1152_v45 = vld [vmem:[#allocation10 + $0x10] sm:$0xff]  }
  0x8b   :  { %1005 = vmatpush3.bf16.msra.mxu0 %v1131_v6  ;;  %1053 = vmatprep.subr.bf16.mxu1 %v1421_v0  ;;  %v949_v32 = vld [vmem:[#allocation7] ss:$0 sm:$0xff]  ;;  %v1150_v43 = vld [vmem:[#allocation10] sm:$0xff]   ;;  %v1151_v44 = vld [vmem:[#allocation10 + $0x8] sm:$0xff]  }
  0x8c   :  { %1006 = vmatprep.subr.bf16.mxu0 %v1132_v7  ;;  %v1153_v46 = vld [vmem:[#allocation10 + $0x18] sm:$0xff]   ;;  %v1154_v47 = vld [vmem:[#allocation10 + $0x20] sm:$0xff]   ;;  %v1155_v48 = vld [vmem:[#allocation10 + $0x28] sm:$0xff]  }
  0x8d   :  { %v1156_v49 = vld [vmem:[#allocation10 + $0x30] sm:$0xff]   ;;  %v1157_v50 = vld [vmem:[#allocation10 + $0x38] sm:$0xff]  }
  0x8e   :  { %1054 = vmatpush3.bf16.msra.mxu1 %v1144_v21  ;;  %v966_v51 = vld [vmem:[#allocation8] ss:$0 sm:$0xff]  ;;  %v1159_v21 = vld [vmem:[%s1781_s8 + $0x8] sm:$0xff]  }
  0x8f   :  { %1007 = vmatpush3.bf16.msra.mxu0 %v1133_v8  ;;  %1055 = vmatprep.subr.bf16.mxu1 %v1421_v0 }
  0x90   :  { %1008 = vmatprep.subr.bf16.mxu0 %v1134_v9 }
  0x92   :  { %1056 = vmatpush3.bf16.msra.mxu1 %v1145_v26  ;;  %v1162_v26 = vld [vmem:[%s1781_s8 + $0x20] sm:$0xff]  }
  0x93   :  { %1009 = vmatpush3.bf16.msra.mxu0 %v1135_v10  ;;  %1057 = vmatprep.subr.bf16.mxu1 %v1421_v0 }
  0x94   :  { %1010 = vmatprep.subr.bf16.mxu0 %v1136_v11 }
  0x96   :  { %1058 = vmatpush3.bf16.msra.mxu1 %v1146_v27  ;;  %v1163_v27 = vld [vmem:[%s1781_s8 + $0x28] sm:$0xff]  }
  0x97   :  { %1011 = vmatpush3.bf16.msra.mxu0 %v1137_v14  ;;  %1059 = vmatprep.subr.bf16.mxu1 %v1421_v0 }
  0x98   :  { %1012 = vmatprep.subr.bf16.mxu0 %v1138_v17 }
  0x9a   :  { %1060 = vmatpush3.bf16.msra.mxu1 %v1147_v28  ;;  %v1164_v28 = vld [vmem:[%s1781_s8 + $0x30] sm:$0xff]  }
  0x9b   :  { %1013 = vmatpush3.bf16.msra.mxu0 %v1139_v19  ;;  %1061 = vmatprep.subr.bf16.mxu1 %v1421_v0 }
  0x9c   :  { %1014 = vmatprep.subr.bf16.mxu0 %v1140_v20  ;;  %v1158_v20 = vld [vmem:[%s1781_s8] sm:$0xff]  }
  0x9e   :  { %1062 = vmatpush3.bf16.msra.mxu1 %v1148_v29  ;;  %v1165_v29 = vld [vmem:[%s1781_s8 + $0x38] sm:$0xff]  }
  0x9f   :  { %1015 = vmatpush3.bf16.msra.mxu0 %v1141_v22  ;;  %1063 = vmatprep.subr.bf16.mxu1 %v1421_v0  ;;  %v1160_v22 = vld [vmem:[%s1781_s8 + $0x10] sm:$0xff]  }
  0xa0   :  { %1069 = vmatprep.subr.bf16.mxu0 %v1421_v0 }
  0xa2   :  { %304 = vmatmul.mubr.bf16.vlgmr.msra.gmra.mrb[0].mxu0 %v134_v25  ;;  %1064 = vmatpush3.bf16.msra.mxu1 %v1149_v30  ;;  %v1161_v25 = vld [vmem:[%s1781_s8 + $0x18] sm:$0xff]   ;;  %v703_v30 = vld [vmem:[#allocation2] sm:$0xff]  ;;  %s1424_s8 = smov 96  }
  0xa3   :  { %1085 = vmatprep.mubr.msk.bf16.mxu0 %vm1422_vm0, %v1421_v0  ;;  %1089 = vmatprep.subr.bf16.mxu1 %v1421_v0 }
  0xa4   :  { %1070 = vmatpush3.bf16.msra.mxu0 %v1150_v43  ;;  %707 = vrot.lane.b32.xlu0 %v703_v30, %s1423_s28 }
  0xa5   :  { %1071 = vmatprep.subr.bf16.mxu0 %v1421_v0 }
  0xa8   :  { %1072 = vmatpush3.bf16.msra.mxu0 %v1151_v44 }
  0xa9   :  { %1073 = vmatprep.subr.bf16.mxu0 %v1421_v0 }
  0xac   :  { %1074 = vmatpush3.bf16.msra.mxu0 %v1152_v45 }
  0xad   :  { %1075 = vmatprep.subr.bf16.mxu0 %v1421_v0 }
  0xb0   :  { %1076 = vmatpush3.bf16.msra.mxu0 %v1153_v46 }
  0xb1   :  { %1077 = vmatprep.subr.bf16.mxu0 %v1421_v0 }
  0xb4   :  { %1078 = vmatpush3.bf16.msra.mxu0 %v1154_v47 }
  0xb5   :  { %1079 = vmatprep.subr.bf16.mxu0 %v1421_v0 }
  0xb8   :  { %1080 = vmatpush3.bf16.msra.mxu0 %v1155_v48 }
  0xb9   :  { %1081 = vmatprep.subr.bf16.mxu0 %v1421_v0 }
  0xbc   :  { %1082 = vmatpush3.bf16.msra.mxu0 %v1156_v49 }
  0xbd   :  { %1083 = vmatprep.subr.bf16.mxu0 %v1421_v0 }
  0xc0   :  { %1084 = vmatpush3.bf16.msra.mxu0 %v1157_v50 }
 0x175   :  { %v1016_v31 = vpop.f32.mrb[0].mxu0 }
 0x176   :  { %v1017_v33 = vpop.f32.mrb[1].mxu0 }
 0x177   :  { %v1018_v34 = vadd.f32 %v1017_v33, %v1016_v31  ;;  %v1019_v35 = vpop.f32.mrb[2].mxu0  ;;  %v704_v31 = vld [vmem:[#allocation2 + $0x8] sm:$0xff] }
 0x178   :  { %v1020_v36 = vpop.f32.mrb[3].mxu0  ;;  %709 = vrot.lane.b32.xlu0 %v704_v31, %s1423_s28 }
 0x179   :  { %v306_v37 = vadd.f32 %v1018_v34, %v949_v32  ;;  %v1021_v38 = vadd.f32 %v1020_v36, %v1019_v35 }
 0x17b   :  { %v309_v39 = vadd.f32 %v1021_v38, %v949_v32  ;;  %1172 = vtanh.f32 %v306_v37  ;;  %v975_v32 = vld [vmem:[#allocation11] ss:$0 sm:$0xff] }
 0x17d   :  { %1174 = vtanh.f32 %v309_v39 }
 0x185   :  { %v1173_v40 = vpop.eup %1172 }
 0x187   :  { %v1175_v41 = vpop.eup %1174 }
 0x188   :  { %v314_v42 = vpack.c.bf16 %v1175_v41, %v1173_v40 }
 0x18a   :  { %1066 = vmatmul.mubr.bf16.vlgmr.msra.gmra.mrb[0].mxu1 %v314_v42 }
 0x18b   :  { %1105 = vmatprep.mubr.msk.bf16.mxu1 %vm1422_vm0, %v1421_v0  ;;  %1090 = vmatpush3.bf16.msra.mxu1 %v1158_v20 }
 0x18c   :  { %1091 = vmatprep.subr.bf16.mxu1 %v1421_v0 }
 0x18f   :  { %1092 = vmatpush3.bf16.msra.mxu1 %v1159_v21 }
 0x190   :  { %1093 = vmatprep.subr.bf16.mxu1 %v1421_v0 }
 0x193   :  { %1094 = vmatpush3.bf16.msra.mxu1 %v1160_v22 }
 0x194   :  { %1095 = vmatprep.subr.bf16.mxu1 %v1421_v0 }
 0x197   :  { %1096 = vmatpush3.bf16.msra.mxu1 %v1161_v25 }
 0x198   :  { %1097 = vmatprep.subr.bf16.mxu1 %v1421_v0 }
 0x19b   :  { %1098 = vmatpush3.bf16.msra.mxu1 %v1162_v26 }
 0x19c   :  { %1099 = vmatprep.subr.bf16.mxu1 %v1421_v0 }
 0x19f   :  { %1100 = vmatpush3.bf16.msra.mxu1 %v1163_v27 }
 0x1a0   :  { %1101 = vmatprep.subr.bf16.mxu1 %v1421_v0 }
 0x1a3   :  { %1102 = vmatpush3.bf16.msra.mxu1 %v1164_v28 }
 0x1a4   :  { %1103 = vmatprep.subr.bf16.mxu1 %v1421_v0 }
 0x1a7   :  { %1104 = vmatpush3.bf16.msra.mxu1 %v1165_v29 }
 0x25d   :  { %v420_v52 = vpop.f32.mrb[0].mxu1 }
 0x25e   :  { %v421_v53 = vadd.f32 %v966_v51, %v420_v52  ;;  %v1067_v54 = vpop.f32.mrb[1].mxu1 }
 0x25f   :  { %v423_v55 = vpop.f32.mrb[2].mxu1 }
 0x260   :  { %v427_v56 = vmax.f32 %v421_v53, 0.0  ;;  %v424_v57 = vadd.f32 %v966_v51, %v423_v55  ;;  %v1068_v58 = vpop.f32.mrb[3].mxu1 }
 0x262   :  { %v429_v59 = vsub.f32 %v421_v53, %v427_v56  ;;  %v435_v60 = vsub.f32 0.0, %v427_v56  ;;  %v428_v61 = vmax.f32 %v424_v57, 0.0 }
 0x264   :  { %v431_v62 = vmul.f32 1.442695, %v429_v59  ;;  %v437_v63 = vmul.f32 1.442695, %v435_v60  ;;  %v430_v1 = vsub.f32 %v424_v57, %v428_v61  ;;  %v436_v2 = vsub.f32 0.0, %v428_v61 }
 0x266   :  { %1176 = vpow2.f32 %v431_v62  ;;  %v433_v3 = vmul.f32 1.442695, %v430_v1  ;;  %v439_v4 = vmul.f32 1.442695, %v436_v2 }
 0x267   :  { %1178 = vpow2.f32 %v437_v63 }
 0x268   :  { %1180 = vpow2.f32 %v433_v3 }
 0x269   :  { %1182 = vpow2.f32 %v439_v4 }
 0x270   :  { %v1177_v5 = vpop.eup %1176 }
 0x271   :  { %v1179_v6 = vpop.eup %1178 }
 0x272   :  { %v1181_v7 = vpop.eup %1180  ;;  %v441_v8 = vadd.f32 %v1179_v6, %v1177_v5 }
 0x273   :  { %v1183_v9 = vpop.eup %1182 }
 0x274   :  { %1184 = vlog2.f32 %v441_v8  ;;  %v442_v10 = vadd.f32 %v1183_v9, %v1181_v7  ;;  %v708_v9 = vpop.permute.xlu0 %707 }
 0x276   :  { %1186 = vlog2.f32 %v442_v10 }
 0x27e   :  { %v1185_v11 = vpop.eup %1184 }
 0x27f   :  { %v444_v14 = vmul.f32 0.6931472, %v1185_v11 }
 0x280   :  { %v1187_v15 = vpop.eup %1186 }
 0x281   :  { %v446_v16 = vmul.f32 0.6931472, %v1187_v15  ;;  %v447_v17 = vadd.f32 %v444_v14, %v427_v56  ;;  %v710_v15 = vpop.permute.xlu0 %709 }
 0x283   :  { %v448_v18 = vadd.f32 %v446_v16, %v428_v61  ;;  %v984_v61 = vld [vmem:[#allocation13] ss:$0 sm:$0xff] }
 0x285   :  { %v449_v19 = vpack.c.bf16 %v448_v18, %v447_v17 }
 0x287   :  { %1086 = vmatmul.mubr.bf16.vlgmr.msra.gmra.mrb[4].mxu0 %v449_v19 }
 0x35a   :  { %v555_v33 = vpop.f32.mrb[4].mxu0 }
 0x35b   :  { %v556_v34 = vadd.f32 %v975_v32, %v555_v33  ;;  %v1087_v35 = vpop.f32.mrb[5].mxu0 }
 0x35c   :  { %v558_v36 = vpop.f32.mrb[6].mxu0 }
 0x35d   :  { %v562_v37 = vmax.f32 %v556_v34, 0.0  ;;  %v559_v38 = vadd.f32 %v975_v32, %v558_v36  ;;  %v1088_v0 = vpop.f32.mrb[7].mxu0  ;;  %v1168_v36 = vld [vmem:[%s1783_s10 + $0x4] ss:$8 sps:$4 sm:$0xff]  }
 0x35e   :  { %826 = vmatprep.subr.bf16.mxu0 %v1168_v36  ;;  %v1171_v0 = vld [vmem:[%s1783_s10 + $0x14] ss:$8 sps:$4 sm:$0xff]  }
 0x35f   :  { %v564_v39 = vsub.f32 %v556_v34, %v562_v37  ;;  %v570_v40 = vsub.f32 0.0, %v562_v37  ;;  %v563_v41 = vmax.f32 %v559_v38, 0.0 }
 0x361   :  { %v566_v42 = vmul.f32 1.442695, %v564_v39  ;;  %v572_v43 = vmul.f32 1.442695, %v570_v40  ;;  %v565_v44 = vsub.f32 %v559_v38, %v563_v41  ;;  %v571_v45 = vsub.f32 0.0, %v563_v41 }
 0x362   :  { %v1166_v38 = vld [vmem:[%s1783_s10] ss:$8 sps:$4 sm:$0xff]   ;;  %v1169_v39 = vld [vmem:[%s1783_s10 + $0x10] ss:$8 sps:$4 sm:$0xff]   ;;  %v1425_v40 = vmov 0  }
 0x363   :  { %1188 = vpow2.f32 %v566_v42  ;;  %v568_v46 = vmul.f32 1.442695, %v565_v44  ;;  %v574_v47 = vmul.f32 1.442695, %v571_v45  ;;  %827 = vmatpush1.bf16.msra.mxu0 %v1166_v38  ;;  %858 = vmatprep.mubr.bf16.mxu0 %v1425_v40 }
 0x364   :  { %1190 = vpow2.f32 %v572_v43  ;;  %828 = vmatprep.subr.bf16.mxu0 %v1171_v0 }
 0x365   :  { %1192 = vpow2.f32 %v568_v46 }
 0x366   :  { %1194 = vpow2.f32 %v574_v47 }
 0x367   :  { %829 = vmatpush1.bf16.msra.mxu0 %v1169_v39 }
 0x36d   :  { %v1189_v48 = vpop.eup %1188 }
 0x36e   :  { %v1191_v49 = vpop.eup %1190 }
 0x36f   :  { %v1193_v50 = vpop.eup %1192  ;;  %v576_v51 = vadd.f32 %v1191_v49, %v1189_v48  ;;  %v793_v48 = vlaneseq }
 0x370   :  { %v1195_v52 = vpop.eup %1194 }
 0x371   :  { %1196 = vlog2.f32 %v576_v51  ;;  %v577_v53 = vadd.f32 %v1195_v52, %v1193_v50  ;;  %v794_v49 = vshrl.u32 %v793_v48, 7  ;;  %v791_v51 = vld [vmem:[%s1784_s11] sm:$0x3]  ;;  %s1426_s11 = smov [#allocation14]  }
 0x372   :  { %s934_s9 = sshll.u32 %s1426_s11, 4  ;;  %s935_s9 = int_to_ptr.vmem [resolvable:$true] %s934_s9 }
 0x373   :  { %1198 = vlog2.f32 %v577_v53  ;;  %v795_v50 = vsub.s32 0, %v794_v49  ;;  %v799_v52 = vsub.s32 1, %v794_v49  ;;  %s1378_s5 = scalar_lea.vmem %s935_s9, 256  ;;  %p1383_p1 = scmp.lt.s32.totalorder %s935_s9, %s935_s9 }
 0x374   :  { %p1379_p0 = scmp.ne.s32.totalorder %s935_s9, %s1378_s5  ;;  %p1384_p2 = scmp.lt.s32.totalorder %s1378_s5, %s1378_s5 }
 0x375   :  { %v796_v53 = vrot.slane %v791_v51, %v795_v50 }
 0x376   :  { %p1385_p3 = por %p1384_p2, %p1383_p1 }
 0x378   :  { %p1386_p4 = pnand %p1385_p3, %p1379_p0 }
 0x37b   :  { %v1197_v54 = vpop.eup %1196 }
 0x37c   :  { %v579_v55 = vmul.f32 0.6931472, %v1197_v54  ;;  %v800_v54 = vrot.slane %v791_v51, %v799_v52 }
 0x37d   :  { %v1199_v56 = vpop.eup %1198 }
 0x37e   :  { %v581_v57 = vmul.f32 0.6931472, %v1199_v56  ;;  %v582_v58 = vadd.f32 %v579_v55, %v562_v37 }
 0x380   :  { %v583_v59 = vadd.f32 %v581_v57, %v563_v41 }
 0x382   :  { %v584_v60 = vpack.c.bf16 %v583_v59, %v582_v58 }
 0x384   :  { %1106 = vmatmul.mubr.bf16.vlgmr.msra.gmra.mrb[4].mxu1 %v584_v60 }
 0x457   :  { %v690_v62 = vpop.f32.mrb[4].mxu1 }
 0x458   :  { %v1696_v63 = vadd.f32 %v984_v61, %v690_v62  ;;  %v1107_v1 = vpop.f32.mrb[5].mxu1 }
 0x459   :  { %v693_v2 = vpop.f32.mrb[6].mxu1 }
 0x45a   :  { %v697_v3 = vmul.f32 0.5, %v1696_v63  ;;  %v1699_v4 = vadd.f32 %v984_v61, %v693_v2  ;;  %v1108_v5 = vpop.f32.mrb[7].mxu1  ;;  %v727_v25 = vmul.f32 %v1696_v63, %v1696_v63 }
 0x45c   :  { %v699_v6 = vmul.f32 1.442695, %v697_v3  ;;  %v698_v7 = vmul.f32 0.5, %v1699_v4  ;;  %v728_v37 = vmul.f32 %v1699_v4, %v1699_v4 }
 0x45e   :  { %1200 = vpow2.f32 %v699_v6  ;;  %v701_v8 = vmul.f32 1.442695, %v698_v7 }
 0x460   :  { %1202 = vpow2.f32 %v701_v8 }
 0x468   :  { %v1702_v10 = vpop.eup %1200 }
 0x469   :  { %v713_v11 = vmul.f32 %v1702_v10, %v708_v9  ;;  %v725_v5 = vmul.f32 %v1702_v10, %v1702_v10 }
 0x46a   :  { %v1705_v14 = vpop.eup %1202 }
 0x46b   :  { %717 = vrot.lane.b32.xlu1 %v713_v11, %s1424_s8  ;;  %v714_v16 = vmul.f32 %v1705_v14, %v710_v15  ;;  %v726_v9 = vmul.f32 %v1705_v14, %v1705_v14  ;;  %v741_v11 = vsub.f32 -0.063497394, %v1696_v63 }
 0x46f   :  { %719 = vrot.lane.b32.xlu1 %v714_v16, %s1424_s8 }
 0x4dd   :  { %v718_v17 = vpop.permute.xlu1 %717 }
 0x4de   :  { %v723_v18 = vadd.f32 %v718_v17, %v1696_v63 }
 0x4e0   :  { %v764_v19 = vsel %vm753_vm1, %v723_v18, -inf }
 0x4e1   :  { %765 = vmax.xlane.f32.xlu0 %v764_v19  ;;  %v720_v20 = vpop.permute.xlu1 %719 }
 0x4e2   :  { %v724_v21 = vadd.f32 %v720_v20, %v1699_v4 }
 0x4e4   :  { %v767_v22 = vsel %vm753_vm1, %v724_v21, -inf }
 0x4e5   :  { %768 = vmax.xlane.f32.xlu1 %v767_v22 }
 0x4f6   :  { %731 = vrot.lane.b32.xlu1 %v727_v25, %s1423_s28 }
 0x56e   :  { %v766_v26 = vpop.xlane.xlu0 %765 }
 0x56f   :  { %v770_v27 = vsub.f32 %v723_v18, %v766_v26  ;;  %v742_v18 = vsub.f32 -0.063497394, %v1699_v4 }
 0x571   :  { %v772_v28 = vmul.f32 1.442695, %v770_v27 }
 0x572   :  { %v769_v29 = vpop.xlane.xlu1 %768 }
 0x573   :  { %1204 = vpow2.f32 %v772_v28  ;;  %v771_v30 = vsub.f32 %v724_v21, %v769_v29 }
 0x575   :  { %v774_v31 = vmul.f32 1.442695, %v771_v30 }
 0x576   :  { %v732_v3 = vpop.permute.xlu1 %731 }
 0x577   :  { %1206 = vpow2.f32 %v774_v31  ;;  %v737_v6 = vadd.f32 %v732_v3, %v725_v5 }
 0x579   :  { %v739_v7 = vmul.f32 1.0655568, %v737_v6 }
 0x57b   :  { %v743_v16 = vadd.f32 %v741_v11, %v739_v7 }
 0x57d   :  { %v1205_v32 = vpop.eup %1204 }
 0x57e   :  { %v776_v33 = vsel %vm753_vm1, %v1205_v32, 0.0 }
 0x57f   :  { %777 = vadd.xlane.f32.xlu0 %v776_v33 }
 0x581   :  { %v1207_v34 = vpop.eup %1206 }
 0x582   :  { %v779_v35 = vsel %vm753_vm1, %v1207_v34, 0.0 }
 0x583   :  { %780 = vadd.xlane.f32.xlu0 %v779_v35  ;;  %v902_v35 = vadd.f32 %v1601_v13, %v1623_v24 }
 0x599   :  { %733 = vrot.lane.b32.xlu0 %v728_v37, %s1423_s28 }
 0x60c   :  { %v778_v41 = vpop.xlane.xlu0 %777 }
 0x60d   :  { %1208 = vrcp.f32 %v778_v41 }
 0x610   :  { %v781_v42 = vpop.xlane.xlu0 %780 }
 0x611   :  { %1210 = vrcp.f32 %v781_v42 }
 0x614   :  { %v734_v8 = vpop.permute.xlu0 %733 }
 0x615   :  { %v738_v15 = vadd.f32 %v734_v8, %v726_v9 }
 0x617   :  { %v1209_v43 = vpop.eup %1208  ;;  %v740_v17 = vmul.f32 1.0655568, %v738_v15 }
 0x618   :  { %v784_v45 = vmul.f32 %v1209_v43, %v1205_v32 }
 0x619   :  { %v744_v19 = vadd.f32 %v742_v18, %v740_v17 }
 0x61b   :  { %v1211_v44 = vpop.eup %1210 }
 0x61c   :  { %v785_v46 = vmul.f32 %v1211_v44, %v1207_v34  ;;  %v899_v34 = vadd.f32 %v1596_v12, %v1618_v23 }
 0x61e   :  { %v786_v47 = vpack.c.bf16 %v785_v46, %v784_v45 }
 0x620   :  { %999 = vmatmul.mubr.msk.bf16.vlgmr.msra.gmra.mrb[8].mxu0 %vm753_vm1, %v786_v47 }
 0x6f3   :  { %v860_v55 = vpop.f32.mrb[8].mxu0 }
 0x6f4   :  { %v861_v56 = vadd.f32 %v860_v55, %v796_v53  ;;  %v862_v57 = vpop.f32.mrb[9].mxu0 }
 0x6f5   :  { %v863_v58 = vadd.f32 %v862_v57, %v800_v54  ;;  %v864_v59 = vpop.f32.mrb[10].mxu0 }
 0x6f6   :  { %v865_v60 = vadd.f32 %v864_v59, %v796_v53  ;;  %v866_v61 = vpop.f32.mrb[11].mxu0  ;;  %v907_v38 = vmul.f32 %v861_v56, %v1618_v23 }
 0x6f7   :  { %v867_v62 = vadd.f32 %v866_v61, %v800_v54  ;;  %v869_v1 = vmax.f32 %v861_v56, %v863_v58  ;;  %v908_v0 = vmul.f32 %v863_v58, %v1596_v12 }
 0x6f8   :  { %v909_v40 = vmul.f32 %v865_v60, %v1623_v24 }
 0x6f9   :  { %870 = vmax.xlane.f32.xlu1 %v869_v1  ;;  %v872_v2 = vmax.f32 %v865_v60, %v867_v62  ;;  %v910_v41 = vmul.f32 %v867_v62, %v1601_v13  ;;  %v911_v43 = vadd.f32 %v908_v0, %v907_v38  ;;  %v920_v13 = vand.u32 127, %v793_v48 }
 0x6fb   :  { %873 = vmax.xlane.f32.xlu0 %v872_v2  ;;  %v914_v44 = vadd.f32 %v910_v41, %v909_v40  ;;  %vm922_vm2 = vcmp.eq.s32.totalorder %v920_v13, 1  ;;  %vm921_vm3 = vcmp.eq.s32.totalorder %v920_v13, 0 }
 0x70a   :  { %747 = vrot.lane.b32.xlu1 %v743_v16, %s1424_s8 }
 0x711   :  { %749 = vrot.lane.b32.xlu0 %v744_v19, %s1424_s8 }
 0x786   :  { %v871_v20 = vpop.xlane.xlu1 %870 }
 0x787   :  { %v875_v10 = vsub.f32 %v861_v56, %v871_v20  ;;  %v876_v21 = vsub.f32 %v863_v58, %v871_v20 }
 0x788   :  { %v874_v22 = vpop.xlane.xlu0 %873 }
 0x789   :  { %v879_v25 = vmul.f32 1.442695, %v875_v10  ;;  %v881_v26 = vmul.f32 1.442695, %v876_v21  ;;  %v877_v27 = vsub.f32 %v865_v60, %v874_v22  ;;  %v878_v14 = vsub.f32 %v867_v62, %v874_v22 }
 0x78a   :  { %v748_v36 = vpop.permute.xlu1 %747 }
 0x78b   :  { %1212 = vpow2.f32 %v879_v25  ;;  %v883_v63 = vmul.f32 1.442695, %v877_v27  ;;  %v885_v28 = vmul.f32 1.442695, %v878_v14  ;;  %v754_v39 = vsel %vm753_vm1, %v748_v36, 0.0 }
 0x78c   :  { %1214 = vpow2.f32 %v881_v26  ;;  %v750_v37 = vpop.permute.xlu0 %749 }
 0x78d   :  { %1216 = vpow2.f32 %v883_v63  ;;  %v757_v42 = vsel %vm753_vm1, %v750_v37, 0.0 }
 0x78e   :  { %1218 = vpow2.f32 %v885_v28 }
 0x795   :  { %v1213_v29 = vpop.eup %1212 }
 0x796   :  { %v1215_v30 = vpop.eup %1214 }
 0x797   :  { %v1217_v4 = vpop.eup %1216  ;;  %v887_v31 = vadd.f32 %v1215_v30, %v1213_v29 }
 0x798   :  { %v1219_v32 = vpop.eup %1218 }
 0x799   :  { %888 = vadd.xlane.f32.xlu1 %v887_v31  ;;  %v890_v33 = vadd.f32 %v1219_v32, %v1217_v4 }
 0x79b   :  { %891 = vadd.xlane.f32.xlu0 %v890_v33 }
 0x79d   :  { %900 = vadd.xlane.f32.xlu1 %v899_v34 }
 0x79f   :  { %903 = vadd.xlane.f32.xlu0 %v902_v35 }
 0x7a1   :  { %755 = vadd.xlane.f32.xlu1 %v754_v39 }
 0x7a3   :  { %758 = vadd.xlane.f32.xlu0 %v757_v42 }
 0x7a5   :  { %912 = vadd.xlane.f32.xlu1 %v911_v43 }
 0x7a7   :  { %915 = vadd.xlane.f32.xlu0 %v914_v44 }
 0x826   :  { %v889_v45 = vpop.xlane.xlu1 %888 }
 0x827   :  { %1220 = vlog2.f32 %v889_v45 }
 0x828   :  { %v892_v46 = vpop.xlane.xlu0 %891 }
 0x829   :  { %1222 = vlog2.f32 %v892_v46 }
 0x82a   :  { %v901_v23 = vpop.xlane.xlu1 %900 }
 0x82c   :  { %v904_v12 = vpop.xlane.xlu0 %903 }
 0x82e   :  { %v756_v49 = vpop.xlane.xlu1 %755 }
 0x82f   :  { %v993_v54 = vadd.f32 -32.0, %v756_v49 }
 0x830   :  { %v759_v24 = vpop.xlane.xlu0 %758 }
 0x831   :  { %v1221_v47 = vpop.eup %1220  ;;  %v994_v57 = vadd.f32 -32.0, %v759_v24  ;;  %v762_v61 = vmul.f32 0.5, %v993_v54 }
 0x832   :  { %v894_v50 = vmul.f32 0.6931472, %v1221_v47  ;;  %v913_v58 = vpop.xlane.xlu1 %912 }
 0x833   :  { %v1223_v51 = vpop.eup %1222  ;;  %v763_v3 = vmul.f32 0.5, %v994_v57 }
 0x834   :  { %v896_v52 = vmul.f32 0.6931472, %v1223_v51  ;;  %v897_v53 = vadd.f32 %v894_v50, %v871_v20  ;;  %v916_v62 = vpop.xlane.xlu0 %915 }
 0x836   :  { %v905_v55 = vmul.f32 %v901_v23, %v897_v53  ;;  %v898_v56 = vadd.f32 %v896_v52, %v874_v22 }
 0x838   :  { %v906_v59 = vmul.f32 %v904_v12, %v898_v56  ;;  %v917_v60 = vsub.f32 %v905_v55, %v913_v58 }
 0x83a   :  { %v923_v1 = vsel %vm922_vm2, %v917_v60, 0.0  ;;  %v918_v2 = vsub.f32 %v906_v59, %v916_v62 }
 0x83b   :  { %v925_v5 = vsel %vm921_vm3, %v762_v61, %v923_v1 }
 0x83c   :  { %v924_v48 = vsel %vm922_vm2, %v918_v2, 0.0  ;;  %927 = vst [vmem:[#allocation14] sm:$0xff] %v925_v5 }
 0x83d   :  { %v926_v6 = vsel %vm921_vm3, %v763_v3, %v924_v48 }
 0x83e   :  { %928 = vst [vmem:[#allocation14 + $0x8] sm:$0xff] %v926_v6 }
 0x83f   :  { %1389 = shalt.err (!%p1386_p4)
}
 0x840   :  { %s1390_s26 = scalar_lea.hbm %s1785_s12, 256 }
 0x841   :  { %p1391_p5 = scmp.ne.s32.totalorder %s1785_s12, %s1390_s26  ;;  %p1394_p6 = scmp.lt.u32.totalorder %s1390_s26, %s1785_s12 }
 0x843   :  { %p1396_p7 = pnand %p1394_p6, %p1391_p5 }
 0x845   :  { %1399 = shalt.err (!%p1396_p7)
}
 0x846   :  { %940 = dma.vmem_to_hbm [thread:$0]  %s935_s9, 256, %s1785_s12, [#allocation4], %s1416_s7, %s1416_s7, %s1417_s20  }
 0x847   :  { %1408 = dma.done.wait [#allocation4], 256  }
 0x848   :  { %1409 = vsyncadd [#allocation4], 4294967040 }
 0x849   :  { %944 = vsyncpa [#allocation3], 1 }
 0x84a   :  { %945 = vsyncpa [#allocation6], 1 }
 0x84b   :  { %946 = vsyncpa [#allocation9], 1 }
 0x84c   :  { %947 = vsyncpa [#allocation12], 1 }
 0x84d   :  { %948 = vsyncpa [#allocation4], 1 }

</bundles_post_ra>
